<compile_context>
chip_gen: v6e
topology: v6e:2x2x1
jax: 0.10.0
libtpu: 0.0.40
codegen_flags: <defaults>
</compile_context>

<pallas_src>
import math

import numpy as np
import jax
import jax.numpy as jnp
from jax.experimental import pallas as pl
from jax.experimental.pallas import tpu as pltpu


# ---------------------------------------------------------------------------
# Detached mask preprocessing (matches F.interpolate bilinear, align_corners=False)
# ---------------------------------------------------------------------------
def _bilinear_matrix(out_size: int, in_size: int) -> jnp.ndarray:
    w = np.zeros((out_size, in_size), dtype=np.float32)
    scale = in_size / out_size
    for o in range(out_size):
        src = (o + 0.5) * scale - 0.5
        src = max(src, 0.0)
        i0 = min(int(math.floor(src)), in_size - 1)
        i1 = min(i0 + 1, in_size - 1)
        l1 = src - i0
        w[o, i0] += 1.0 - l1
        w[o, i1] += l1
    return jnp.asarray(w)


def _resize_and_flatten(mask, H, W):
    """Bilinear resize (align_corners=False) of (B, 1, Hm, Wm) logits to (B, H*W)."""
    B, cm, hm, wm = mask.shape
    assert cm == 1  # TODO(synk): Cm>1 masks use a row-wise zero-fix keyed on channel 0; only Cm==1 modeled.
    wh = _bilinear_matrix(H, hm)
    ww = _bilinear_matrix(W, wm)
    m = jnp.einsum('hi,bij,wj->bhw', wh, mask[:, 0], ww)
    return m.reshape(B, H * W)


# ---------------------------------------------------------------------------
# Pallas kernel: streamed batch-axis normalization + masked pooled sums
# ---------------------------------------------------------------------------
def _contra_pool_kernel(ex_ref, ey_ref, bx_ref, by_ref, fx_ref, fy_ref):
    i = pl.program_id(1)              # inner ("arbitrary") streaming axis

    @pl.when(i == 0)
    def _init():
        fx_ref[...] = jnp.zeros_like(fx_ref)
        fy_ref[...] = jnp.zeros_like(fy_ref)

    # Upcast per tile (bf16 upstream streams halve HBM bytes); accumulate in f32.
    ex = ex_ref[...].astype(jnp.float32)      # (B, C, T)
    ey = ey_ref[...].astype(jnp.float32)
    bx = bx_ref[...].astype(jnp.float32)      # (B, 1, T) pre-thresholded {0,1}
    by = by_ref[...].astype(jnp.float32)

    # F.normalize(dim=0): L2 over the *batch* axis, per (c, t), eps=1e-12.
    # rsqrt(max(sumsq, eps^2)) == 1 / max(norm, eps): one EUP op per (c, t).
    inv_nx = jax.lax.rsqrt(jnp.maximum(jnp.sum(ex * ex, axis=0, keepdims=True), 1e-24))
    inv_ny = jax.lax.rsqrt(jnp.maximum(jnp.sum(ey * ey, axis=0, keepdims=True), 1e-24))
    ex_n = ex * inv_nx
    ey_n = ey * inv_ny

    # Masked pooled sum on the MXU: batched matmul contracting the lane axis.
    # (flash-attention 'bqd,bkd->bqk' pattern with N=1; MXU is otherwise idle.)
    fx_ref[...] += jnp.einsum('bct,bnt->bcn', ex_n, bx,
                              preferred_element_type=jnp.float32)[None]
    fy_ref[...] += jnp.einsum('bct,bnt->bcn', ey_n, by,
                              preferred_element_type=jnp.float32)[None]


# ---------------------------------------------------------------------------
# Tiling / VMEM budgeting
# ---------------------------------------------------------------------------
def _round_up(x, m):
    return ((x + m - 1) // m) * m


def _vmem_capacity_bytes() -> int:
    try:
        info = pltpu.get_tpu_info()
        cap = getattr(info, "vmem_capacity_bytes", None)
        if cap:
            return int(cap)
    except Exception:
        pass
    return 64 << 20   # conservative fallback (v7x per-TC physical VMEM)


def _choose_tiling(hw_pad, per_lane_bytes, budget, max_lane_tile=None):
    """Largest 128-multiple lane tile dividing hw_pad that fits the budget;
    prefer tile counts that split evenly across 2 cores (v7x parallel axis)."""
    limit = hw_pad if max_lane_tile is None else min(hw_pad, max_lane_tile)
    limit = min(limit, 32768)
    cands = [t for t in range(128, limit + 1, 128)
             if hw_pad % t == 0 and per_lane_bytes * t <= budget]
    if not cands:
        cands = [128]
    even = [t for t in cands if (hw_pad // t) % 2 == 0]
    if even and max(even) * 4 >= max(cands):
        t = max(even)
    else:
        t = max(cands)
    n_tiles = hw_pad // t
    n_cores = 2 if n_tiles % 2 == 0 else 1
    return t, n_tiles // n_cores, n_cores


# ---------------------------------------------------------------------------
# Wrapper
# ---------------------------------------------------------------------------
def contra_loss(embedd_x, embedd_y, mask_x, mask_y, temperature=0.3,
                max_lane_tile=None):
    B, C, H, W = embedd_x.shape
    hw = H * W

    ex = embedd_x.reshape(B, C, hw)           # keep upstream dtype (f32 or bf16)
    ey = embedd_y.reshape(B, C, hw)

    # Detached mask preprocessing: bilinear resize of logits, then threshold.
    # sigmoid(z) > 0.5  <=>  z > 0 (clamp(0,1) is a no-op) — sigmoid is applied
    # AFTER interpolation in the reference, so this is exact.
    mx = _resize_and_flatten(mask_x.astype(jnp.float32), H, W)
    my = _resize_and_flatten(mask_y.astype(jnp.float32), H, W)
    bx = mx > 0.0
    by = my > 0.0

    # Pixel counts + empty-mask fix (tiny, detached) stay in JAX.
    sx = jnp.sum(bx, axis=-1, keepdims=True).astype(jnp.float32)
    sy = jnp.sum(by, axis=-1, keepdims=True).astype(jnp.float32)
    sx = jnp.where(sx == 0.0, 1.0, sx)
    sy = jnp.where(sy == 0.0, 1.0, sy)

    # Lane-align HW: zero-pad embeddings and (binary) masks; padded pixels have
    # mask 0 so they contribute nothing to the pooled sums.
    hw_pad = _round_up(hw, 128)
    pad = hw_pad - hw
    if pad:
        ex = jnp.pad(ex, ((0, 0), (0, 0), (0, pad)))
        ey = jnp.pad(ey, ((0, 0), (0, 0), (0, pad)))
        bx = jnp.pad(bx, ((0, 0), (0, pad)))
        by = jnp.pad(by, ((0, 0), (0, pad)))

    # Pre-thresholded masks stream as bf16 (exact for {0,1}), shaped (B, 1, HW)
    # so they feed the batched MXU dot without any in-kernel relayout.
    bx = bx.astype(jnp.bfloat16)[:, None, :]
    by = by.astype(jnp.bfloat16)[:, None, :]

    # Generation-aware VMEM budget: physical capacity minus headroom.
    itemsize = ex.dtype.itemsize
    pack = 16 if itemsize <= 2 else 8
    cpad = _round_up(C, pack)
    c8 = _round_up(C, 8)
    per_lane = (2 * 2 * B * cpad * itemsize      # ex/ey double-buffered tiles
                + 2 * 2 * B * 16 * 2             # bx/by (B,1,t) bf16, 1->16 sublanes
                + 4 * B * c8 * 4 + 4 * c8 * 4)   # f32 in-kernel working temporaries
    cap = _vmem_capacity_bytes()
    vmem_limit = int(max(cap - (8 << 20), 32 << 20))   # leave headroom (v7x: 64 MiB)
    tile_budget = max(vmem_limit - (8 << 20), 12 << 20)

    t, tpc, n_cores = _choose_tiling(hw_pad, per_lane, tile_budget, max_lane_tile)

    fx_part, fy_part = pl.pallas_call(
        _contra_pool_kernel,
        out_shape=(
            jax.ShapeDtypeStruct((n_cores, B, C, 1), jnp.float32),
            jax.ShapeDtypeStruct((n_cores, B, C, 1), jnp.float32),
        ),
        grid=(n_cores, tpc),
        in_specs=[
            pl.BlockSpec((B, C, t), lambda p, i: (0, 0, p * tpc + i)),
            pl.BlockSpec((B, C, t), lambda p, i: (0, 0, p * tpc + i)),
            pl.BlockSpec((B, 1, t), lambda p, i: (0, 0, p * tpc + i)),
            pl.BlockSpec((B, 1, t), lambda p, i: (0, 0, p * tpc + i)),
        ],
        out_specs=(
            pl.BlockSpec((1, B, C, 1), lambda p, i: (p, 0, 0, 0)),
            pl.BlockSpec((1, B, C, 1), lambda p, i: (p, 0, 0, 0)),
        ),
        compiler_params=pltpu.CompilerParams(
            dimension_semantics=("parallel", "arbitrary"),
            vmem_limit_bytes=vmem_limit),
    )(ex, ey, bx, by)

    # O(B*C + B^2) epilogue in plain JAX (negligible; lets the per-core
    # partials combine regardless of how many cores the grid was split over).
    fx = jnp.sum(fx_part, axis=0)[..., 0] / sx        # (B, C)
    fy = jnp.sum(fy_part, axis=0)[..., 0] / sy
    nx = jnp.linalg.norm(fx, axis=-1, keepdims=True)
    ny = jnp.linalg.norm(fy, axis=-1, keepdims=True)
    sim = (fx @ fy.T) / jnp.maximum(nx * ny.T, 1e-8) / temperature
    smax = jnp.max(sim)                                # cancels in the ratio
    e = jnp.exp(sim - smax)
    return -jnp.log(jnp.sum(jnp.diag(e)) / jnp.sum(e))


# ---------------------------------------------------------------------------
# Pure-JAX mirror of the PyTorch forward (sanity check)
# ---------------------------------------------------------------------------
def _reference_loss(embedd_x, embedd_y, mask_x, mask_y, temperature=0.3):
    B, C, H, W = embedd_x.shape
    ex = embedd_x.reshape(B, C, H * W).astype(jnp.float32)
    ey = embedd_y.reshape(B, C, H * W).astype(jnp.float32)
    mx = _resize_and_flatten(mask_x.astype(jnp.float32), H, W)
    my = _resize_and_flatten(mask_y.astype(jnp.float32), H, W)

    ex_n = ex / jnp.maximum(jnp.sqrt(jnp.sum(ex * ex, axis=0, keepdims=True)), 1e-12)
    ey_n = ey / jnp.maximum(jnp.sqrt(jnp.sum(ey * ey, axis=0, keepdims=True)), 1e-12)
    bx = (jax.nn.sigmoid(mx) > 0.5).astype(jnp.float32)
    by = (jax.nn.sigmoid(my) > 0.5).astype(jnp.float32)
    sx = jnp.sum(bx, axis=-1, keepdims=True)
    sy = jnp.sum(by, axis=-1, keepdims=True)
    sx = jnp.where(sx == 0.0, 1.0, sx)
    sy = jnp.where(sy == 0.0, 1.0, sy)
    fx = jnp.sum(ex_n * bx[:, None, :], axis=-1) / sx
    fy = jnp.sum(ey_n * by[:, None, :], axis=-1) / sy
    nx = jnp.linalg.norm(fx, axis=-1, keepdims=True)
    ny = jnp.linalg.norm(fy, axis=-1, keepdims=True)
    sim = (fx @ fy.T) / jnp.maximum(nx * ny.T, 1e-8) / temperature
    e = jnp.exp(sim)
    return -jnp.log(jnp.sum(jnp.diag(e)) / jnp.sum(e))


if __name__ == "__main__":
    B, C, H, W = 2, 4, 16, 16
    Hm = Wm = 32
    key = jax.random.PRNGKey(0)
    k1, k2, k3, k4 = jax.random.split(key, 4)
    embedd_x = jax.random.normal(k1, (B, C, H, W), jnp.float32)
    embedd_y = jax.random.normal(k2, (B, C, H, W), jnp.float32)
    mask_x = jax.random.normal(k3, (B, 1, Hm, Wm), jnp.float32)
    mask_y = jax.random.normal(k4, (B, 1, Hm, Wm), jnp.float32)

    ref = _reference_loss(embedd_x, embedd_y, mask_x, mask_y)

    # Default tiling.
    loss = jax.block_until_ready(contra_loss(embedd_x, embedd_y, mask_x, mask_y))
    assert bool(jnp.isfinite(loss)), "kernel produced non-finite loss"
    assert abs(float(loss) - float(ref)) < 2e-2, (float(loss), float(ref))

    # Forced small tile: exercises multi-step streaming and the per-core
    # partial-output path (grid = (2, 1)).
    loss_tiled = jax.block_until_ready(
        contra_loss(embedd_x, embedd_y, mask_x, mask_y, max_lane_tile=128))
    assert bool(jnp.isfinite(loss_tiled)), "tiled kernel produced non-finite loss"
    assert abs(float(loss_tiled) - float(ref)) < 2e-2, (float(loss_tiled), float(ref))

    # bf16 embedding streaming path (f32 accumulation inside the kernel).
    ex_bf = embedd_x.astype(jnp.bfloat16)
    ey_bf = embedd_y.astype(jnp.bfloat16)
    ref_bf = _reference_loss(ex_bf, ey_bf, mask_x, mask_y)
    loss_bf = jax.block_until_ready(contra_loss(ex_bf, ey_bf, mask_x, mask_y))
    assert bool(jnp.isfinite(loss_bf)), "bf16 kernel produced non-finite loss"
    assert abs(float(loss_bf) - float(ref_bf)) < 5e-2, (float(loss_bf), float(ref_bf))

    # Non-128-aligned spatial size: exercises the HW zero-padding path.
    Ho = Wo = 10
    e1 = jax.random.normal(k1, (B, C, Ho, Wo), jnp.float32)
    e2 = jax.random.normal(k2, (B, C, Ho, Wo), jnp.float32)
    m1 = jax.random.normal(k3, (B, 1, 20, 20), jnp.float32)
    m2 = jax.random.normal(k4, (B, 1, 20, 20), jnp.float32)
    ref_odd = _reference_loss(e1, e2, m1, m2)
    loss_odd = jax.block_until_ready(contra_loss(e1, e2, m1, m2))
    assert bool(jnp.isfinite(loss_odd)), "padded kernel produced non-finite loss"
    assert abs(float(loss_odd) - float(ref_odd)) < 2e-2, (float(loss_odd), float(ref_odd))

    print("KERNEL_OK")
</pallas_src>

<mosaic_0001>
module attributes {stable_mosaic.version = 11 : i64} {
  func.func @_contra_pool_kernel(%arg0: i32, %arg1: i32, %arg2: memref<2x4x128xf32, #tpu.memory_space<vmem>>, %arg3: memref<2x4x128xf32, #tpu.memory_space<vmem>>, %arg4: memref<2x1x128xbf16, #tpu.memory_space<vmem>>, %arg5: memref<2x1x128xbf16, #tpu.memory_space<vmem>>, %arg6: memref<1x2x4x1xf32, #tpu.memory_space<vmem>>, %arg7: memref<1x2x4x1xf32, #tpu.memory_space<vmem>>) attributes {dimension_semantics = [#tpu.dimension_semantics<parallel>, #tpu.dimension_semantics<arbitrary>], iteration_bounds = array<i64: 2, 1>, scalar_prefetch = 0 : i64, scratch_operands = 0 : i64, tpu.core_type = #tpu.core_type<tc>, window_params = [{transform_indices = @transform_0, window_bounds = array<i64: 2, 4, 128>}, {transform_indices = @transform_1, window_bounds = array<i64: 2, 4, 128>}, {transform_indices = @transform_2, window_bounds = array<i64: 2, 1, 128>}, {transform_indices = @transform_3, window_bounds = array<i64: 2, 1, 128>}, {transform_indices = @transform_4, window_bounds = array<i64: 1, 2, 4, 1>}, {transform_indices = @transform_5, window_bounds = array<i64: 1, 2, 4, 1>}]} {
    %c0_i32 = arith.constant 0 : i32
    %0 = arith.cmpi eq, %arg1, %c0_i32 : i32
    %1 = arith.extui %0 : i1 to i32
    %c0_i32_0 = arith.constant 0 : i32
    %2 = arith.cmpi ne, %1, %c0_i32_0 : i32
    scf.if %2 {
      %cst_33 = arith.constant 0.000000e+00 : f32
      %35 = vector.broadcast %cst_33 : f32 to vector<1x2x4x1xf32>
      %c0_34 = arith.constant 0 : index
      %c0_35 = arith.constant 0 : index
      %c0_36 = arith.constant 0 : index
      %c0_37 = arith.constant 0 : index
      %36 = vector.load %arg6[%c0_34, %c0_35, %c0_36, %c0_37] : memref<1x2x4x1xf32, #tpu.memory_space<vmem>>, vector<1x2x4x1xf32>
      tpu.vector_store %arg6[%c0_34, %c0_35, %c0_36, %c0_37], %35 {strides = array<i32>} : memref<1x2x4x1xf32, #tpu.memory_space<vmem>>, vector<1x2x4x1xf32>,
      %cst_38 = arith.constant 0.000000e+00 : f32
      %37 = vector.broadcast %cst_38 : f32 to vector<1x2x4x1xf32>
      %c0_39 = arith.constant 0 : index
      %c0_40 = arith.constant 0 : index
      %c0_41 = arith.constant 0 : index
      %c0_42 = arith.constant 0 : index
      %38 = vector.load %arg7[%c0_39, %c0_40, %c0_41, %c0_42] : memref<1x2x4x1xf32, #tpu.memory_space<vmem>>, vector<1x2x4x1xf32>
      tpu.vector_store %arg7[%c0_39, %c0_40, %c0_41, %c0_42], %37 {strides = array<i32>} : memref<1x2x4x1xf32, #tpu.memory_space<vmem>>, vector<1x2x4x1xf32>,
    } else {
    }
    %c0 = arith.constant 0 : index
    %c0_1 = arith.constant 0 : index
    %c0_2 = arith.constant 0 : index
    %3 = vector.load %arg2[%c0, %c0_1, %c0_2] : memref<2x4x128xf32, #tpu.memory_space<vmem>>, vector<2x4x128xf32>
    %c0_3 = arith.constant 0 : index
    %c0_4 = arith.constant 0 : index
    %c0_5 = arith.constant 0 : index
    %4 = vector.load %arg3[%c0_3, %c0_4, %c0_5] : memref<2x4x128xf32, #tpu.memory_space<vmem>>, vector<2x4x128xf32>
    %c0_6 = arith.constant 0 : index
    %c0_7 = arith.constant 0 : index
    %c0_8 = arith.constant 0 : index
    %5 = vector.load %arg4[%c0_6, %c0_7, %c0_8] : memref<2x1x128xbf16, #tpu.memory_space<vmem>>, vector<2x1x128xbf16>
    %6 = arith.extf %5 : vector<2x1x128xbf16> to vector<2x1x128xf32>
    %c0_9 = arith.constant 0 : index
    %c0_10 = arith.constant 0 : index
    %c0_11 = arith.constant 0 : index
    %7 = vector.load %arg5[%c0_9, %c0_10, %c0_11] : memref<2x1x128xbf16, #tpu.memory_space<vmem>>, vector<2x1x128xbf16>
    %8 = arith.extf %7 : vector<2x1x128xbf16> to vector<2x1x128xf32>
    %9 = arith.mulf %3, %3 : vector<2x4x128xf32>
    %cst = arith.constant dense<0.000000e+00> : vector<4x128xf32>
    %10 = vector.multi_reduction <add>, %9, %cst [0] : vector<2x4x128xf32> to vector<4x128xf32>
    %11 = vector.shape_cast %10 : vector<4x128xf32> to vector<1x4x128xf32>
    %cst_12 = arith.constant 1.000000e-24 : f32
    %12 = vector.broadcast %cst_12 : f32 to vector<1x4x128xf32>
    %13 = arith.maximumf %11, %12 : vector<1x4x128xf32>
    %14 = math.rsqrt %13 : vector<1x4x128xf32>
    %15 = arith.mulf %4, %4 : vector<2x4x128xf32>
    %cst_13 = arith.constant dense<0.000000e+00> : vector<4x128xf32>
    %16 = vector.multi_reduction <add>, %15, %cst_13 [0] : vector<2x4x128xf32> to vector<4x128xf32>
    %17 = vector.shape_cast %16 : vector<4x128xf32> to vector<1x4x128xf32>
    %cst_14 = arith.constant 1.000000e-24 : f32
    %18 = vector.broadcast %cst_14 : f32 to vector<1x4x128xf32>
    %19 = arith.maximumf %17, %18 : vector<1x4x128xf32>
    %20 = math.rsqrt %19 : vector<1x4x128xf32>
    %21 = vector.broadcast %14 : vector<1x4x128xf32> to vector<2x4x128xf32>
    %22 = arith.mulf %3, %21 : vector<2x4x128xf32>
    %23 = vector.broadcast %20 : vector<1x4x128xf32> to vector<2x4x128xf32>
    %24 = arith.mulf %4, %23 : vector<2x4x128xf32>
    %c0_15 = arith.constant 0 : index
    %c0_16 = arith.constant 0 : index
    %c0_17 = arith.constant 0 : index
    %c0_18 = arith.constant 0 : index
    %25 = vector.load %arg6[%c0_15, %c0_16, %c0_17, %c0_18] : memref<1x2x4x1xf32, #tpu.memory_space<vmem>>, vector<1x2x4x1xf32>
    "tpu.trace_start"() <{level = 10 : i32, message = "bct,bnt->bcn"}> : () -> ()
    %cst_19 = arith.constant dense<0.000000e+00> : vector<2x4x1xf32>
    %26 = tpu.matmul %22, %6, %cst_19 {dimension_numbers = #tpu.dot_dimension_numbers<[2], [2], [1], [1], [0, 0, 0, 1, 1, 1], [0], [0]>} : vector<2x4x128xf32>, vector<2x1x128xf32>, vector<2x4x1xf32> -> vector<2x4x1xf32>
    "tpu.trace_stop"() : () -> ()
    %27 = vector.shape_cast %26 : vector<2x4x1xf32> to vector<1x2x4x1xf32>
    %28 = arith.addf %25, %27 : vector<1x2x4x1xf32>
    %c0_20 = arith.constant 0 : index
    %c0_21 = arith.constant 0 : index
    %c0_22 = arith.constant 0 : index
    %c0_23 = arith.constant 0 : index
    %29 = vector.load %arg6[%c0_20, %c0_21, %c0_22, %c0_23] : memref<1x2x4x1xf32, #tpu.memory_space<vmem>>, vector<1x2x4x1xf32>
    tpu.vector_store %arg6[%c0_20, %c0_21, %c0_22, %c0_23], %28 {strides = array<i32>} : memref<1x2x4x1xf32, #tpu.memory_space<vmem>>, vector<1x2x4x1xf32>,
    %c0_24 = arith.constant 0 : index
    %c0_25 = arith.constant 0 : index
    %c0_26 = arith.constant 0 : index
    %c0_27 = arith.constant 0 : index
    %30 = vector.load %arg7[%c0_24, %c0_25, %c0_26, %c0_27] : memref<1x2x4x1xf32, #tpu.memory_space<vmem>>, vector<1x2x4x1xf32>
    "tpu.trace_start"() <{level = 10 : i32, message = "bct,bnt->bcn"}> : () -> ()
    %cst_28 = arith.constant dense<0.000000e+00> : vector<2x4x1xf32>
    %31 = tpu.matmul %24, %8, %cst_28 {dimension_numbers = #tpu.dot_dimension_numbers<[2], [2], [1], [1], [0, 0, 0, 1, 1, 1], [0], [0]>} : vector<2x4x128xf32>, vector<2x1x128xf32>, vector<2x4x1xf32> -> vector<2x4x1xf32>
    "tpu.trace_stop"() : () -> ()
    %32 = vector.shape_cast %31 : vector<2x4x1xf32> to vector<1x2x4x1xf32>
    %33 = arith.addf %30, %32 : vector<1x2x4x1xf32>
    %c0_29 = arith.constant 0 : index
    %c0_30 = arith.constant 0 : index
    %c0_31 = arith.constant 0 : index
    %c0_32 = arith.constant 0 : index
    %34 = vector.load %arg7[%c0_29, %c0_30, %c0_31, %c0_32] : memref<1x2x4x1xf32, #tpu.memory_space<vmem>>, vector<1x2x4x1xf32>
    tpu.vector_store %arg7[%c0_29, %c0_30, %c0_31, %c0_32], %33 {strides = array<i32>} : memref<1x2x4x1xf32, #tpu.memory_space<vmem>>, vector<1x2x4x1xf32>,
    return
  }
  func.func @transform_0(%arg0: i32, %arg1: i32) -> (i32, i32, i32) {
    %c1_i32 = arith.constant 1 : i32
    %0 = arith.muli %arg0, %c1_i32 : i32
    %1 = arith.addi %0, %arg1 : i32
    %c0_i32 = arith.constant 0 : i32
    %c0_i32_0 = arith.constant 0 : i32
    %c0_i32_1 = arith.constant 0 : i32
    return %c0_i32, %c0_i32_0, %1 : i32, i32, i32
  }
  func.func @transform_1(%arg0: i32, %arg1: i32) -> (i32, i32, i32) {
    %c1_i32 = arith.constant 1 : i32
    %0 = arith.muli %arg0, %c1_i32 : i32
    %1 = arith.addi %0, %arg1 : i32
    %c0_i32 = arith.constant 0 : i32
    %c0_i32_0 = arith.constant 0 : i32
    %c0_i32_1 = arith.constant 0 : i32
    return %c0_i32, %c0_i32_0, %1 : i32, i32, i32
  }
  func.func @transform_2(%arg0: i32, %arg1: i32) -> (i32, i32, i32) {
    %c1_i32 = arith.constant 1 : i32
    %0 = arith.muli %arg0, %c1_i32 : i32
    %1 = arith.addi %0, %arg1 : i32
    %c0_i32 = arith.constant 0 : i32
    %c0_i32_0 = arith.constant 0 : i32
    %c0_i32_1 = arith.constant 0 : i32
    return %c0_i32, %c0_i32_0, %1 : i32, i32, i32
  }
  func.func @transform_3(%arg0: i32, %arg1: i32) -> (i32, i32, i32) {
    %c1_i32 = arith.constant 1 : i32
    %0 = arith.muli %arg0, %c1_i32 : i32
    %1 = arith.addi %0, %arg1 : i32
    %c0_i32 = arith.constant 0 : i32
    %c0_i32_0 = arith.constant 0 : i32
    %c0_i32_1 = arith.constant 0 : i32
    return %c0_i32, %c0_i32_0, %1 : i32, i32, i32
  }
  func.func @transform_4(%arg0: i32, %arg1: i32) -> (i32, i32, i32, i32) {
    %c0_i32 = arith.constant 0 : i32
    %c0_i32_0 = arith.constant 0 : i32
    %c0_i32_1 = arith.constant 0 : i32
    %c0_i32_2 = arith.constant 0 : i32
    return %arg0, %c0_i32, %c0_i32_0, %c0_i32_1 : i32, i32, i32, i32
  }
  func.func @transform_5(%arg0: i32, %arg1: i32) -> (i32, i32, i32, i32) {
    %c0_i32 = arith.constant 0 : i32
    %c0_i32_0 = arith.constant 0 : i32
    %c0_i32_1 = arith.constant 0 : i32
    %c0_i32_2 = arith.constant 0 : i32
    return %arg0, %c0_i32, %c0_i32_0, %c0_i32_1 : i32, i32, i32, i32
  }
}

</mosaic_0001>

<bundles_post_ra>
// kernel: tpu_custom_call.1
= control target key start
LH: loop header
LB: loop body
LE: loop exit
PB: predicated region body
PF: predicated region fallthrough
CT: control target
= control target key end

     0   :  { %s1081_s0 = inlined_call_operand.hbm [shape: f32[2,4,256], index: 0, kind: input, shape index: {}]   ;;  %s1082_s1 = inlined_call_operand.hbm [shape: f32[2,4,256], index: 1, kind: input, shape index: {}]   ;;  %s1083_s2 = inlined_call_operand.vmem [shape: bf16[2,1,256], index: 2, kind: input, shape index: {}]   ;;  %s1084_s3 = inlined_call_operand.vmem [shape: bf16[2,1,256], index: 3, kind: input, shape index: {}]   ;;  %s1085_s4 = inlined_call_operand.vmem [shape: f32[2,2,4,1], index: 4, kind: output, shape index: {0}]   ;;  %s1086_s5 = inlined_call_operand.vmem [shape: f32[2,2,4,1], index: 5, kind: output, shape index: {1}]  }
   0x1   :  { %1088 = sst [smem:[#allocation12_spill]] %s1081_s0 }
   0x2   :  { %11 = vsyncpa [#allocation3], 0 }
   0x3   :  { %13 = vsyncpa [#allocation3 + $0x1], 0 }
   0x4   :  { %14 = vsyncpa [#allocation5], 0 }
   0x5   :  { %16 = vsyncpa [#allocation5 + $0x1], 0  ;;  %s921_s18 = smov 0   ;;  %s923_s19 = smov 0  }
   0x6   :  { %s925_s20 = smov 0   ;;  %s927_s21 = smov 0  }
   0x7   :  { %s929_s22 = smov 0   ;;  %s931_s23 = smov 0  }
   0x8 LB: > { %s694_s24 = sadd.s32 4294967295, %s883_s23   ;;  %s34_s25 = sadd.s32 1, %s879_s22  ;;  %s883_s23 = sphi %s931_s23, %s22_s23   ;;  %s879_s22 = sphi %s929_s22, %s1100_s22   ;;  %s875_s21 = sphi %s927_s21, %s1099_s21   ;;  %s871_s20 = sphi %s925_s20, %s1098_s20   ;;  %s867_s19 = sphi %s923_s19, %s1097_s19   ;;  %s863_s18 = sphi %s921_s18, %s1096_s18  }
   0x9   : > { %p36_p0 = scmp.ge.s32.totalorder %s34_s25, 2  ;;  %s43_s26 = sadd.s32 1, %s871_s20 }
   0xa   : > { %p50_p1 = scmp.ne.s32.totalorder %s871_s20, %s867_s19  ;;  %p51_p2 = scmp.eq.s32.totalorder %s883_s23, 0 }
   0xb   : > { %s1102_s25 = smov (%p36_p0, %s34_s25), 0  ;;  %p56_p4 = scmp.ne.s32.totalorder %s867_s19, %s863_s18 }
   0xc   : > { %1089 = sst [smem:[#allocation10_spill]] %s1102_s25  ;;  %p957_p3 = por %p51_p2, %p50_p1 }
   0xd   : > { %s40_s28 = ssub.s32 %s879_s22, %s1102_s25  ;;  %p57_p5 = scmp.eq.s32.totalorder %s694_s24, 0 }
   0xe   : > { %p41_p6 = scmp.eq.s32.totalorder %s40_s28, 0  ;;  %p697_p8 = scmp.ge.s32.totalorder %s883_s23, 2 }
   0xf   : > { %p964_p7 = por %p57_p5, %p56_p4  ;;  %s973_s6 = sand.u32 (!%p697_p8), 1, %s871_s20  }
  0x10   : > { %s969_s30 = scalar_select %p41_p6, %s871_s20, %s43_s26  }
  0x11   : > { %212 = sbr.rel (%p697_p8) target bundleno = 57 (0x39), region = 16  ;;  %s699_s7 = sshll.u32 (!%p697_p8), %s879_s22, 6 }
  0x12   : > { %1092 = sst [smem:[#allocation11_spill]] %s969_s30  ;;  %s698_s8 = sshll.u32 (!%p697_p8), %s973_s6, 3 }
  0x13   : > { %s1093_s0 = sld [smem:[#allocation12_spill]] (!%p697_p8)  ;;  %s220_s12 = scalar_lea.vmem (!%p697_p8), [#allocation2], %s698_s8 }
  0x14   : > { %s227_s13 = sshll.u32 (!%p697_p8), %s220_s12, 4  ;;  %s217_s14 = scalar_lea.sflag (!%p697_p8), [#allocation3], %s973_s6  ;;  %s228_s13 = int_to_ptr.vmem [resolvable:$true] %s227_s13 }
  0x15   : > { %s789_s15 = scalar_lea.vmem (!%p697_p8), %s228_s13, 128  ;;  %s885_s16 = smov (!%p697_p8), [#allocation2]  }
  0x16   : > { %p790_p9 = scmp.ne.s32.totalorder %s228_s13, %s789_s15  ;;  %s793_s17 = sshll.u32 %s885_s16, 4  ;;  %s794_s17 = int_to_ptr.vmem [resolvable:$false] %s793_s17 }
  0x17   : > { %s795_s18 = scalar_lea.vmem %s794_s17, 256  ;;  %p796_p12 = scmp.lt.s32.totalorder %s228_s13, %s794_s17 }
  0x18   : > { %p791_p10 = pnand %p790_p9, %p957_p3  ;;  %p797_p13 = scmp.lt.s32.totalorder %s795_s18, %s789_s15 }
  0x19   : > { %s226_s11 = scalar_lea.hbm %s1093_s0, %s699_s7 }
  0x1a   : > { %p792_p11 = pneg %p791_p10  ;;  %p798_p0 = por %p797_p13, %p796_p12 }
  0x1c   : > { %p799_p1 = pnand %p798_p0, %p792_p11 }
  0x1e   : > { %802 = shalt.err (!%p799_p1)
}
  0x1f   : > { %s886_s24 = smov 128   ;;  %s887_s26 = smov 64  }
  0x20   : > { %s888_s28 = smov 4   ;;  %s247_s12 = scalar_lea.hbm %s1082_s1, %s699_s7 }
  0x21   : > { %717 = dma.hbm_to_vmem [thread:$0]  (%p957_p3), %s226_s11, 128, %s228_s13, %s217_s14, %s886_s24, %s887_s26, %s888_s28  }
  0x22   : > { %s241_s16 = scalar_lea.vmem [#allocation4], %s698_s8  ;;  %s238_s17 = scalar_lea.sflag [#allocation5], %s973_s6 }
  0x23   : > { %s248_s0 = sshll.u32 %s241_s16, 4  ;;  %s889_s18 = smov [#allocation4]   ;;  %s249_s0 = int_to_ptr.vmem [resolvable:$true] %s248_s0 }
  0x24   : > { %s815_s15 = scalar_lea.vmem %s249_s0, 128  ;;  %s819_s25 = sshll.u32 %s889_s18, 4  ;;  %s820_s25 = int_to_ptr.vmem [resolvable:$false] %s819_s25 }
  0x25   : > { %p816_p2 = scmp.ne.s32.totalorder %s249_s0, %s815_s15  ;;  %s821_s30 = scalar_lea.vmem %s820_s25, 256 }
  0x26   : > { %p822_p6 = scmp.lt.s32.totalorder %s249_s0, %s820_s25  ;;  %p823_p8 = scmp.lt.s32.totalorder %s821_s30, %s815_s15 }
  0x27   : > { %p817_p4 = pnand %p816_p2, %p957_p3 }
  0x28   : > { %p824_p9 = por %p823_p8, %p822_p6 }
  0x29   : > { %p818_p5 = pneg %p817_p4 }
  0x2b   : > { %p825_p10 = pnand %p824_p9, %p818_p5 }
  0x2d   : > { %828 = shalt.err (!%p825_p10)
}
  0x2e   : > { %718 = dma.hbm_to_vmem [thread:$0]  (%p957_p3), %s247_s12, 128, %s249_s0, %s238_s17, %s886_s24, %s887_s26, %s888_s28  }
  0x2f   : > { %257 = sbr.rel (!%p957_p3) target bundleno = 52 (0x34), region = 28  ;;  %s702_s7 = sshll.u32 (%p957_p3), %s973_s6, 1 }
  0x30   : > { %s263_s13 = scalar_lea.vmem (%p957_p3), %s1083_s2, %s879_s22  ;;  %s261_s25 = scalar_lea.vmem (%p957_p3), [#allocation6], %s702_s7 }
  0x31   : > { %v280_v0 = vld [vmem:[%s263_s13] sm:$0x1] (%p957_p3)  ;;  %v282_v1 = vld [vmem:[%s263_s13 + $0x2] sm:$0x1] (%p957_p3) }
  0x32   : > { %281 = vst [vmem:[%s261_s25] sm:$0x1] (%p957_p3), %v280_v0  ;;  %283 = vst [vmem:[%s261_s25 + $0x1] sm:$0x1] (%p957_p3), %v282_v1 }
  0x34 PF: > { %303 = sbr.rel (!%p957_p3) target bundleno = 57 (0x39), region = 62  ;;  %s703_s0 = sshll.u32 (%p957_p3), %s973_s6, 1 }
  0x35   : > { %s309_s24 = scalar_lea.vmem (%p957_p3), %s1084_s3, %s879_s22  ;;  %s307_s26 = scalar_lea.vmem (%p957_p3), [#allocation7], %s703_s0 }
  0x36   : > { %v326_v2 = vld [vmem:[%s309_s24] sm:$0x1] (%p957_p3)  ;;  %v328_v3 = vld [vmem:[%s309_s24 + $0x2] sm:$0x1] (%p957_p3) }
  0x37   : > { %327 = vst [vmem:[%s307_s26] sm:$0x1] (%p957_p3), %v326_v2  ;;  %329 = vst [vmem:[%s307_s26 + $0x1] sm:$0x1] (%p957_p3), %v328_v3 }
  0x39 PF: > { %p704_p11 = scmp.ge.s32.totalorder %s883_s23, 1  ;;  %p348_p12 = scmp.lt.s32.totalorder %s883_s23, 3 }
  0x3b   : > { %p349_p13 = pnand %p704_p11, %p348_p12 }
  0x3c   : > { %s1010_s27 = sand.u32 (!%p349_p13), 1, %s867_s19  }
  0x3d   : > { %352 = sbr.rel (%p349_p13) target bundleno = 243 (0xf3), region = 96  ;;  %s705_s6 = sshll.u32 (!%p349_p13), %s1010_s27, 3 }
  0x3e   : > { %s355_s28 = scalar_lea.sflag (!%p349_p13), [#allocation3], %s1010_s27  ;;  %s358_s9 = scalar_lea.vmem (!%p349_p13), [#allocation2], %s705_s6 }
  0x42   : > { %854 = dma.done.wait (%p964_p7), %s355_s28, 128  }
  0x43   : > { %856 = vsyncadd (%p964_p7), %s355_s28, 4294967168  ;;  %s364_s10 = scalar_lea.sflag [#allocation5], %s1010_s27  ;;  %s367_s12 = scalar_lea.vmem [#allocation4], %s705_s6 }
  0x44   : > { %858 = dma.done.wait (%p964_p7), %s364_s10, 128  }
  0x45   : > { %860 = vsyncadd (%p964_p7), %s364_s10, 4294967168  ;;  %p430_p3 = scmp.lt.s32.totalorder %s875_s21, 1  ;;  %vm444_vm0 = vcmask 3072   ;;  %v890_v4 = vmov 0.0   ;;  %v451_v5 = vld [vmem:[%s367_s12] sm:$0xf]  ;;  %v482_v21 = vlaneseq }
  0x46   : > { %v452_v6 = vld [vmem:[%s367_s12 + $0x4] sm:$0xf]  ;;  %vm463_vm1 = vcmask 1043456   ;;  %v469_v7 = vmul.f32 %v451_v5, %v451_v5  ;;  %v449_v9 = vld [vmem:[%s358_s9] sm:$0xf]  ;;  %s707_s29 = sshll.u32 %s1010_s27, 1 }
  0x47   : > { %s1104_s21 = smov (!%p430_p3, %s875_s21), 1  ;;  %v470_v8 = vmul.f32 %v452_v6, %v452_v6  ;;  %v450_v10 = vld [vmem:[%s358_s9 + $0x4] sm:$0xf]  ;;  %v461_v11 = vmul.f32 %v449_v9, %v449_v9  ;;  %v483_v22 = vshrl.u32 %v482_v21, 7  ;;  %s382_s7 = scalar_lea.vmem [#allocation7], %s707_s29 }
  0x48   : > { %s715_s16 = sshll.u32 %s1104_s21, 3  ;;  %v462_v12 = vmul.f32 %v450_v10, %v450_v10  ;;  %v471_v13 = vsel %vm463_vm1, %v469_v7, 0.0  ;;  %v457_v23 = vld [vmem:[%s382_s7] sm:$0x1]  ;;  %v458_v24 = vld [vmem:[%s382_s7 + $0x1] sm:$0x1] }
  0x49   : > { %s1033_s18 = scalar_lea.vmem %s1086_s5, %s715_s16  ;;  %v472_v14 = vsel %vm463_vm1, %v470_v8, 0.0  ;;  %v464_v16 = vsel %vm463_vm1, %v461_v11, 0.0  ;;  %s375_s8 = scalar_lea.vmem [#allocation6], %s707_s29  ;;  %v459_v27 = vunpack.c.l.bf16 %v457_v23  ;;  %v484_v28 = vsub.s32 0, %v483_v22 }
  0x4a   : > { %447 = vst.msk [vmem:[%s1033_s18] sm:$0xf] %vm444_vm0, %v890_v4  ;;  %448 = vst.msk [vmem:[%s1033_s18 + $0x4] sm:$0xf] %vm444_vm0, %v890_v4  ;;  %v473_v15 = vadd.f32 %v472_v14, %v471_v13  ;;  %v465_v17 = vsel %vm463_vm1, %v462_v12, 0.0  ;;  %v460_v29 = vunpack.c.l.bf16 %v458_v24  ;;  %s434_s25 = scalar_lea.vmem %s1085_s4, %s715_s16 }
  0x4b   : > { %v466_v18 = vadd.f32 %v465_v17, %v464_v16  ;;  %v453_v25 = vld [vmem:[%s375_s8] sm:$0x1]  ;;  %v454_v26 = vld [vmem:[%s375_s8 + $0x1] sm:$0x1]  ;;  %v508_v32 = vrot.slane %v459_v27, %v484_v28  ;;  %445 = vst.msk [vmem:[%s434_s25] sm:$0xf] %vm444_vm0, %v890_v4 }
  0x4c   : > { %v474_v19 = vmax.f32 %v473_v15, 1e-24  ;;  %v455_v30 = vunpack.c.l.bf16 %v453_v25  ;;  %v456_v31 = vunpack.c.l.bf16 %v454_v26  ;;  %v516_v33 = vrot.slane %v460_v29, %v484_v28  ;;  %446 = vst.msk [vmem:[%s434_s25 + $0x4] sm:$0xf] %vm444_vm0, %v890_v4 }
  0x4d   : > { %v467_v20 = vmax.f32 %v466_v18, 1e-24 }
  0x4e   : > { %773 = vrsqrt.f32 %v474_v19  ;;  %v485_v35 = vrot.slane %v455_v30, %v484_v28  ;;  %v493_v36 = vrot.slane %v456_v31, %v484_v28 }
  0x4f   : > { %775 = vrsqrt.f32 %v467_v20 }
  0x51   : > { %v503_v50 = vld [vmem:[%s1033_s18] sm:$0xf]  ;;  %v504_v56 = vld [vmem:[%s1033_s18 + $0x4] sm:$0xf] }
  0x52   : > { %v480_v51 = vld [vmem:[%s434_s25] sm:$0xf] }
  0x53   : > { %v481_v57 = vld [vmem:[%s434_s25 + $0x4] sm:$0xf] }
  0x5b   : > { %v774_v34 = vpop.eup %773 }
  0x5c   : > { %v776_v37 = vpop.eup %775  ;;  %v478_v38 = vmul.f32 %v774_v34, %v451_v5  ;;  %v479_v39 = vmul.f32 %v774_v34, %v452_v6 }
  0x5d   : > { %v476_v40 = vmul.f32 %v776_v37, %v449_v9  ;;  %v477_v41 = vmul.f32 %v776_v37, %v450_v10 }
  0x5e   : > { %v509_v42 = vmul.f32 %v508_v32, %v478_v38  ;;  %v517_v43 = vmul.f32 %v516_v33, %v479_v39 }
  0x5f   : > { %v486_v44 = vmul.f32 %v485_v35, %v476_v40  ;;  %v494_v45 = vmul.f32 %v493_v36, %v477_v41 }
  0x60   : > { %v510_v46 = vsel %vm463_vm1, %v509_v42, 0.0  ;;  %v518_v48 = vsel %vm463_vm1, %v517_v43, 0.0 }
  0x61   : > { %511 = vadd.xlane.f32.xlu1 %v510_v46  ;;  %v487_v47 = vsel %vm463_vm1, %v486_v44, 0.0  ;;  %v495_v49 = vsel %vm463_vm1, %v494_v45, 0.0 }
  0x62   : > { %488 = vadd.xlane.f32.xlu0 %v487_v47 }
  0x65   : > { %519 = vadd.xlane.f32.xlu1 %v518_v48 }
  0x66   : > { %496 = vadd.xlane.f32.xlu0 %v495_v49 }
  0xea   : > { %v512_v52 = vpop.xlane.xlu1 %511 }
  0xeb   : > { %v521_v53 = vadd.f32 %v512_v52, %v503_v50  ;;  %v489_v54 = vpop.xlane.xlu0 %488 }
  0xec   : > { %v498_v55 = vadd.f32 %v489_v54, %v480_v51 }
  0xed   : > { %523 = vst.msk [vmem:[%s1033_s18] sm:$0xf] %vm444_vm0, %v521_v53 }
  0xee   : > { %501 = vst.msk [vmem:[%s434_s25] sm:$0xf] %vm444_vm0, %v498_v55  ;;  %v520_v58 = vpop.xlane.xlu1 %519 }
  0xef   : > { %v522_v59 = vadd.f32 %v520_v58, %v504_v56  ;;  %v497_v60 = vpop.xlane.xlu0 %496 }
  0xf0   : > { %v499_v61 = vadd.f32 %v497_v60, %v481_v57 }
  0xf1   : > { %524 = vst.msk [vmem:[%s1033_s18 + $0x4] sm:$0xf] %vm444_vm0, %v522_v59 }
  0xf2   : > { %502 = vst.msk [vmem:[%s434_s25 + $0x4] sm:$0xf] %vm444_vm0, %v499_v61 }
  0xf3 PF: > { %s22_s23 = sadd.s32 1, %s883_s23   ;;  %s1094_s21 = sld [smem:[#allocation11_spill]] }
  0xf4   : > { %p19_p7 = scmp.ge.s32.totalorder %s22_s23, 4   ;;  %s1095_s0 = sld [smem:[#allocation10_spill]] }
  0xf5   : > { %s1096_s18 = smov %s867_s19  ;;  %s1097_s19 = smov %s871_s20 }
  0xf6   :  { %21 = sbr.rel (!%p19_p7) target bundleno = 8 (0x8), region = 189 }
  0xf9   : > { %s1098_s20 = smov %s1094_s21  ;;  %s1099_s21 = smov %s879_s22 }
  0xfa   : > { %s1100_s22 = smov %s1095_s0 }
  0xfb   :  { %562 = vsyncpa [#allocation3], 1 }
  0xfc   :  { %564 = vsyncpa [#allocation3 + $0x1], 1 }
  0xfd   :  { %565 = vsyncpa [#allocation5], 1 }
  0xfe   :  { %567 = vsyncpa [#allocation5 + $0x1], 1 }

</bundles_post_ra>
